<compile_context>
chip_gen: v5e
topology: v5e:2x2
jax: 0.10.0
libtpu: 0.0.40
codegen_flags: <defaults>
</compile_context>

<pallas_src>
import functools

import jax
import jax.numpy as jnp
from jax.experimental import pallas as pl
from jax.experimental.pallas import tpu as pltpu


def _mcritic_kernel(s_ref, a_ref, w1s_ref, w1a_ref, b1_ref,
                    w2_ref, b2_ref, w3_ref, b3_ref, o_ref):
    # fc1 over the (states, actions) concat, realized as two dots so no concat is
    # ever materialized (W1 rows are ordered states-then-actions, matching torch.cat).
    h1 = (jnp.dot(s_ref[...], w1s_ref[...], preferred_element_type=jnp.float32)
          + jnp.dot(a_ref[...], w1a_ref[...], preferred_element_type=jnp.float32)
          + b1_ref[...])
    h1 = jnp.maximum(h1, 0.0)

    # fc2 + ReLU
    h2 = jnp.dot(h1, w2_ref[...], preferred_element_type=jnp.float32) + b2_ref[...]
    h2 = jnp.maximum(h2, 0.0)

    # fc3 (+ bias broadcast from a (1, out) VMEM block)
    o_ref[...] = (jnp.dot(h2, w3_ref[...], preferred_element_type=jnp.float32)
                  + b3_ref[...]).astype(o_ref.dtype)


def _round_up(x, m):
    return ((x + m - 1) // m) * m


def _pick_batch_tile(padded, tb_max):
    """Largest multiple of 128 that divides `padded` and is <= tb_max.

    If that would leave a single grid step, prefer a >=256 tile giving >=2 steps
    (keeps both TensorCores busy on v7x; negligible cost on v5e/v6e).
    """
    k = padded // 128
    candidates = [128 * d for d in range(1, k + 1) if k % d == 0 and 128 * d <= tb_max]
    tb = max(candidates) if candidates else 128
    if padded // tb < 2:
        two_step = [c for c in candidates if padded // c >= 2 and c >= 256]
        if two_step:
            tb = max(two_step)
    return tb


@functools.partial(jax.jit, static_argnames=("tb_max",))
def mcritic_forward(states, actions, params, tb_max=1024):
    """states: [B, state_dim*n_agent], actions: [B, action_dim*n_agent] -> [B, out]."""
    w1, b1, w2, b2, w3, b3 = params
    batch, state_feat = states.shape
    act_feat = actions.shape[1]
    hidden = w1.shape[1]
    out_size = w3.shape[1]

    # Split W1 once by the concat order (states first, then actions).  Everything is
    # kept in natural [in, out] / [B, feat] layout -> zero wrapper transposes.
    states = jnp.asarray(states, jnp.float32)
    actions = jnp.asarray(actions, jnp.float32)
    w1s = jnp.asarray(w1[:state_feat], jnp.float32)   # [state_feat, hidden]
    w1a = jnp.asarray(w1[state_feat:], jnp.float32)   # [act_feat, hidden]
    w2f = jnp.asarray(w2, jnp.float32)                # [hidden, hidden]
    w3f = jnp.asarray(w3, jnp.float32)                # [hidden, out]
    b1f = jnp.asarray(b1, jnp.float32).reshape(1, hidden)
    b2f = jnp.asarray(b2, jnp.float32).reshape(1, hidden)
    b3f = jnp.asarray(b3, jnp.float32).reshape(1, out_size)

    # Pad the batch to a multiple of 128 only (no-op for the common case of
    # 128-aligned training batches), then pick a tile that divides it exactly.
    tb_max = max(128, (int(tb_max) // 128) * 128)
    padded = _round_up(batch, 128)
    tb = _pick_batch_tile(padded, tb_max)
    if padded != batch:
        pad = padded - batch
        states = jnp.pad(states, ((0, pad), (0, 0)))
        actions = jnp.pad(actions, ((0, pad), (0, 0)))

    flops = 2 * batch * ((state_feat + act_feat) * hidden
                         + hidden * hidden + hidden * out_size)
    bytes_accessed = (batch * (state_feat + act_feat + out_size) * 4
                      + (w1.size + w2.size + w3.size) * 4
                      + (b1.size + b2.size + b3.size) * 4)
    cost = pl.CostEstimate(flops=int(flops), transcendentals=0,
                           bytes_accessed=int(bytes_accessed))

    out = pl.pallas_call(
        _mcritic_kernel,
        out_shape=jax.ShapeDtypeStruct((padded, out_size), jnp.float32),
        grid=(padded // tb,),
        in_specs=[
            # Streamed, batch-tiled activations (natural layout, no wrapper reshuffle).
            pl.BlockSpec((tb, state_feat), lambda i: (i, 0)),
            pl.BlockSpec((tb, act_feat), lambda i: (i, 0)),
            # Weights/biases: constant index_map -> stay VMEM-resident across the grid.
            pl.BlockSpec((state_feat, hidden), lambda i: (0, 0)),
            pl.BlockSpec((act_feat, hidden), lambda i: (0, 0)),
            pl.BlockSpec((1, hidden), lambda i: (0, 0)),
            pl.BlockSpec((hidden, hidden), lambda i: (0, 0)),
            pl.BlockSpec((1, hidden), lambda i: (0, 0)),
            pl.BlockSpec((hidden, out_size), lambda i: (0, 0)),
            pl.BlockSpec((1, out_size), lambda i: (0, 0)),
        ],
        out_specs=pl.BlockSpec((tb, out_size), lambda i: (i, 0)),
        compiler_params=pltpu.CompilerParams(
            dimension_semantics=("parallel",)),
        cost_estimate=cost,
    )(states, actions, w1s, w1a, b1f, w2f, b2f, w3f, b3f)

    return out if padded == batch else out[:batch]


def init_mcritic_params(key, n_agent, state_dim, action_dim, hidden_size,
                        output_size=1):
    """PyTorch-style (uniform +-1/sqrt(fan_in)) init. Weights stored as [in, out]
    (already transposed relative to nn.Linear.weight)."""
    in_size = (state_dim + action_dim) * n_agent
    dims = [(in_size, hidden_size), (hidden_size, hidden_size),
            (hidden_size, output_size)]
    params = []
    for (fan_in, fan_out) in dims:
        key, kw, kb = jax.random.split(key, 3)
        bound = 1.0 / jnp.sqrt(jnp.float32(fan_in))
        w = jax.random.uniform(kw, (fan_in, fan_out), jnp.float32, -bound, bound)
        b = jax.random.uniform(kb, (1, fan_out), jnp.float32, -bound, bound)
        params += [w, b]
    return tuple(params)


def mcritic_reference(states, actions, params):
    """Plain-JAX reference mirroring the PyTorch forward."""
    w1, b1, w2, b2, w3, b3 = params
    x = jnp.concatenate([states, actions], axis=1)
    h = jax.nn.relu(x @ w1 + b1)
    h = jax.nn.relu(h @ w2 + b2)
    return h @ w3 + b3


if __name__ == "__main__":
    n_agent, state_dim, action_dim, hidden_size, output_size = 2, 4, 2, 32, 1

    key = jax.random.PRNGKey(0)
    key, ks, ka, kp = jax.random.split(key, 4)
    params = init_mcritic_params(kp, n_agent, state_dim, action_dim, hidden_size,
                                 output_size)

    # Small batch: padded to one 128-row tile, single grid step.
    batch = 8
    states = jax.random.normal(ks, (batch, state_dim * n_agent), jnp.float32)
    actions = jax.random.normal(ka, (batch, action_dim * n_agent), jnp.float32)

    out = mcritic_forward(states, actions, params)
    jax.block_until_ready(out)
    ref = mcritic_reference(states, actions, params)
    assert out.shape == (batch, output_size), out.shape
    assert jnp.allclose(out, ref, atol=1e-5, rtol=1e-4), "f32 mismatch vs reference"

    # Batch not divisible by 128 with a small tile cap -> pads 300 -> 384,
    # tb=128, 3-step grid with resident weights and "parallel" semantics.
    key, ks2, ka2 = jax.random.split(key, 3)
    batch2 = 300
    states2 = jax.random.normal(ks2, (batch2, state_dim * n_agent), jnp.float32)
    actions2 = jax.random.normal(ka2, (batch2, action_dim * n_agent), jnp.float32)
    out2 = mcritic_forward(states2, actions2, params, tb_max=128)
    jax.block_until_ready(out2)
    ref2 = mcritic_reference(states2, actions2, params)
    assert out2.shape == (batch2, output_size), out2.shape
    assert jnp.allclose(out2, ref2, atol=1e-5, rtol=1e-4), "tiled f32 mismatch"

    # 128-aligned batch: exercises the ">=2 grid steps" tile heuristic (512 -> tb=256).
    key, ks3, ka3 = jax.random.split(key, 3)
    batch3 = 512
    states3 = jax.random.normal(ks3, (batch3, state_dim * n_agent), jnp.float32)
    actions3 = jax.random.normal(ka3, (batch3, action_dim * n_agent), jnp.float32)
    out3 = mcritic_forward(states3, actions3, params)
    jax.block_until_ready(out3)
    ref3 = mcritic_reference(states3, actions3, params)
    assert out3.shape == (batch3, output_size), out3.shape
    assert jnp.allclose(out3, ref3, atol=1e-5, rtol=1e-4), "aligned f32 mismatch"

    print("KERNEL_OK")
</pallas_src>

<mosaic_0001>
module attributes {stable_mosaic.version = 11 : i64} {
  func.func @_mcritic_kernel(%arg0: i32, %arg1: memref<128x8xf32, #tpu.memory_space<vmem>>, %arg2: memref<128x4xf32, #tpu.memory_space<vmem>>, %arg3: memref<8x32xf32, #tpu.memory_space<vmem>>, %arg4: memref<4x32xf32, #tpu.memory_space<vmem>>, %arg5: memref<1x32xf32, #tpu.memory_space<vmem>>, %arg6: memref<32x32xf32, #tpu.memory_space<vmem>>, %arg7: memref<1x32xf32, #tpu.memory_space<vmem>>, %arg8: memref<32x1xf32, #tpu.memory_space<vmem>>, %arg9: memref<1x1xf32, #tpu.memory_space<vmem>>, %arg10: memref<128x1xf32, #tpu.memory_space<vmem>>) attributes {dimension_semantics = [#tpu.dimension_semantics<parallel>], iteration_bounds = array<i64: 1>, scalar_prefetch = 0 : i64, scratch_operands = 0 : i64, tpu.core_type = #tpu.core_type<tc>, window_params = [{transform_indices = @transform_0, window_bounds = array<i64: 128, 8>}, {transform_indices = @transform_1, window_bounds = array<i64: 128, 4>}, {pipeline_mode = #tpu.pipeline_mode<synchronous>, transform_indices = @transform_2, window_bounds = array<i64: 8, 32>}, {pipeline_mode = #tpu.pipeline_mode<synchronous>, transform_indices = @transform_3, window_bounds = array<i64: 4, 32>}, {pipeline_mode = #tpu.pipeline_mode<synchronous>, transform_indices = @transform_4, window_bounds = array<i64: 1, 32>}, {pipeline_mode = #tpu.pipeline_mode<synchronous>, transform_indices = @transform_5, window_bounds = array<i64: 32, 32>}, {pipeline_mode = #tpu.pipeline_mode<synchronous>, transform_indices = @transform_6, window_bounds = array<i64: 1, 32>}, {pipeline_mode = #tpu.pipeline_mode<synchronous>, transform_indices = @transform_7, window_bounds = array<i64: 32, 1>}, {pipeline_mode = #tpu.pipeline_mode<synchronous>, transform_indices = @transform_8, window_bounds = array<i64: 1, 1>}, {transform_indices = @transform_9, window_bounds = array<i64: 128, 1>}]} {
    %c0 = arith.constant 0 : index
    %c0_0 = arith.constant 0 : index
    %0 = vector.load %arg1[%c0, %c0_0] : memref<128x8xf32, #tpu.memory_space<vmem>>, vector<128x8xf32>
    %c0_1 = arith.constant 0 : index
    %c0_2 = arith.constant 0 : index
    %1 = vector.load %arg3[%c0_1, %c0_2] : memref<8x32xf32, #tpu.memory_space<vmem>>, vector<8x32xf32>
    %cst = arith.constant dense<0.000000e+00> : vector<128x32xf32>
    %2 = tpu.matmul %0, %1, %cst {dimension_numbers = #tpu.dot_dimension_numbers<[1], [0], [0], [1], [0, 0, 1, 1], [], []>} : vector<128x8xf32>, vector<8x32xf32>, vector<128x32xf32> -> vector<128x32xf32>
    %c0_3 = arith.constant 0 : index
    %c0_4 = arith.constant 0 : index
    %3 = vector.load %arg2[%c0_3, %c0_4] : memref<128x4xf32, #tpu.memory_space<vmem>>, vector<128x4xf32>
    %c0_5 = arith.constant 0 : index
    %c0_6 = arith.constant 0 : index
    %4 = vector.load %arg4[%c0_5, %c0_6] : memref<4x32xf32, #tpu.memory_space<vmem>>, vector<4x32xf32>
    %cst_7 = arith.constant dense<0.000000e+00> : vector<128x32xf32>
    %5 = tpu.matmul %3, %4, %cst_7 {dimension_numbers = #tpu.dot_dimension_numbers<[1], [0], [0], [1], [0, 0, 1, 1], [], []>} : vector<128x4xf32>, vector<4x32xf32>, vector<128x32xf32> -> vector<128x32xf32>
    %6 = arith.addf %2, %5 : vector<128x32xf32>
    %c0_8 = arith.constant 0 : index
    %c0_9 = arith.constant 0 : index
    %7 = vector.load %arg5[%c0_8, %c0_9] : memref<1x32xf32, #tpu.memory_space<vmem>>, vector<1x32xf32>
    %8 = vector.broadcast %7 : vector<1x32xf32> to vector<128x32xf32>
    %9 = arith.addf %6, %8 : vector<128x32xf32>
    %cst_10 = arith.constant 0.000000e+00 : f32
    %10 = vector.broadcast %cst_10 : f32 to vector<128x32xf32>
    %11 = arith.maximumf %9, %10 : vector<128x32xf32>
    %c0_11 = arith.constant 0 : index
    %c0_12 = arith.constant 0 : index
    %12 = vector.load %arg6[%c0_11, %c0_12] : memref<32x32xf32, #tpu.memory_space<vmem>>, vector<32x32xf32>
    %cst_13 = arith.constant dense<0.000000e+00> : vector<128x32xf32>
    %13 = tpu.matmul %11, %12, %cst_13 {dimension_numbers = #tpu.dot_dimension_numbers<[1], [0], [0], [1], [0, 0, 1, 1], [], []>} : vector<128x32xf32>, vector<32x32xf32>, vector<128x32xf32> -> vector<128x32xf32>
    %c0_14 = arith.constant 0 : index
    %c0_15 = arith.constant 0 : index
    %14 = vector.load %arg7[%c0_14, %c0_15] : memref<1x32xf32, #tpu.memory_space<vmem>>, vector<1x32xf32>
    %15 = vector.broadcast %14 : vector<1x32xf32> to vector<128x32xf32>
    %16 = arith.addf %13, %15 : vector<128x32xf32>
    %cst_16 = arith.constant 0.000000e+00 : f32
    %17 = vector.broadcast %cst_16 : f32 to vector<128x32xf32>
    %18 = arith.maximumf %16, %17 : vector<128x32xf32>
    %c0_17 = arith.constant 0 : index
    %c0_18 = arith.constant 0 : index
    %19 = vector.load %arg8[%c0_17, %c0_18] : memref<32x1xf32, #tpu.memory_space<vmem>>, vector<32x1xf32>
    %cst_19 = arith.constant dense<0.000000e+00> : vector<128x1xf32>
    %20 = tpu.matmul %18, %19, %cst_19 {dimension_numbers = #tpu.dot_dimension_numbers<[1], [0], [0], [1], [0, 0, 1, 1], [], []>} : vector<128x32xf32>, vector<32x1xf32>, vector<128x1xf32> -> vector<128x1xf32>
    %c0_20 = arith.constant 0 : index
    %c0_21 = arith.constant 0 : index
    %21 = vector.load %arg9[%c0_20, %c0_21] : memref<1x1xf32, #tpu.memory_space<vmem>>, vector<1x1xf32>
    %22 = vector.broadcast %21 : vector<1x1xf32> to vector<128x1xf32>
    %23 = arith.addf %20, %22 : vector<128x1xf32>
    %c0_22 = arith.constant 0 : index
    %c0_23 = arith.constant 0 : index
    %24 = vector.load %arg10[%c0_22, %c0_23] : memref<128x1xf32, #tpu.memory_space<vmem>>, vector<128x1xf32>
    tpu.vector_store %arg10[%c0_22, %c0_23], %23 {strides = array<i32>} : memref<128x1xf32, #tpu.memory_space<vmem>>, vector<128x1xf32>,
    return
  }
  func.func @transform_0(%arg0: i32) -> (i32, i32) {
    %c0_i32 = arith.constant 0 : i32
    %c0_i32_0 = arith.constant 0 : i32
    return %arg0, %c0_i32 : i32, i32
  }
  func.func @transform_1(%arg0: i32) -> (i32, i32) {
    %c0_i32 = arith.constant 0 : i32
    %c0_i32_0 = arith.constant 0 : i32
    return %arg0, %c0_i32 : i32, i32
  }
  func.func @transform_2(%arg0: i32) -> (i32, i32) {
    %c0_i32 = arith.constant 0 : i32
    %c0_i32_0 = arith.constant 0 : i32
    %c0_i32_1 = arith.constant 0 : i32
    return %c0_i32, %c0_i32_0 : i32, i32
  }
  func.func @transform_3(%arg0: i32) -> (i32, i32) {
    %c0_i32 = arith.constant 0 : i32
    %c0_i32_0 = arith.constant 0 : i32
    %c0_i32_1 = arith.constant 0 : i32
    return %c0_i32, %c0_i32_0 : i32, i32
  }
  func.func @transform_4(%arg0: i32) -> (i32, i32) {
    %c0_i32 = arith.constant 0 : i32
    %c0_i32_0 = arith.constant 0 : i32
    %c0_i32_1 = arith.constant 0 : i32
    return %c0_i32, %c0_i32_0 : i32, i32
  }
  func.func @transform_5(%arg0: i32) -> (i32, i32) {
    %c0_i32 = arith.constant 0 : i32
    %c0_i32_0 = arith.constant 0 : i32
    %c0_i32_1 = arith.constant 0 : i32
    return %c0_i32, %c0_i32_0 : i32, i32
  }
  func.func @transform_6(%arg0: i32) -> (i32, i32) {
    %c0_i32 = arith.constant 0 : i32
    %c0_i32_0 = arith.constant 0 : i32
    %c0_i32_1 = arith.constant 0 : i32
    return %c0_i32, %c0_i32_0 : i32, i32
  }
  func.func @transform_7(%arg0: i32) -> (i32, i32) {
    %c0_i32 = arith.constant 0 : i32
    %c0_i32_0 = arith.constant 0 : i32
    %c0_i32_1 = arith.constant 0 : i32
    return %c0_i32, %c0_i32_0 : i32, i32
  }
  func.func @transform_8(%arg0: i32) -> (i32, i32) {
    %c0_i32 = arith.constant 0 : i32
    %c0_i32_0 = arith.constant 0 : i32
    %c0_i32_1 = arith.constant 0 : i32
    return %c0_i32, %c0_i32_0 : i32, i32
  }
  func.func @transform_9(%arg0: i32) -> (i32, i32) {
    %c0_i32 = arith.constant 0 : i32
    %c0_i32_0 = arith.constant 0 : i32
    return %arg0, %c0_i32 : i32, i32
  }
}

</mosaic_0001>

<bundles_post_ra>
// kernel: mcritic_forward.1
= control target key start
LH: loop header
LB: loop body
LE: loop exit
PB: predicated region body
PF: predicated region fallthrough
CT: control target
= control target key end

     0   :  { %vm117_vm0 = vcmask 1043456   ;;  %vm68_vm1 = vcmask 31744   ;;  %vm186_vm2 = vcmask 64512   ;;  %vm344_vm3 = vcmask 261120   ;;  %s1033_s3 = inlined_call_operand.vmem [shape: f32[4,32], index: 3, kind: input, shape index: {}]   ;;  %s1034_s2 = inlined_call_operand.vmem [shape: f32[8,32], index: 2, kind: input, shape index: {}]   ;;  %s1035_s1 = inlined_call_operand.vmem [shape: f32[128,4], index: 1, kind: input, shape index: {}]   ;;  %s1036_s0 = inlined_call_operand.vmem [shape: f32[128,8], index: 0, kind: input, shape index: {}]   ;;  %s1037_s4 = inlined_call_operand.vmem [shape: f32[1,32], index: 4, kind: input, shape index: {}]   ;;  %s1038_s5 = inlined_call_operand.vmem [shape: f32[32,32], index: 5, kind: input, shape index: {}]   ;;  %s1039_s6 = inlined_call_operand.vmem [shape: f32[1,32], index: 6, kind: input, shape index: {}]   ;;  %s1040_s7 = inlined_call_operand.vmem [shape: f32[32,1], index: 7, kind: input, shape index: {}]   ;;  %s1041_s8 = inlined_call_operand.<no memory space> [shape: f32[1,1], index: 8, kind: input, shape index: {}]   ;;  %s1042_s9 = inlined_call_operand.vmem [shape: f32[128,1], index: 9, kind: output, shape index: {}]  }
   0x1   :  { %v67_v0 = vld [vmem:[%s1033_s3] sm:$0xf]  ;;  %v52_v4 = vld [vmem:[%s1035_s1 + $0x8] sm:$0xff]  ;;  %v53_v6 = vld [vmem:[%s1035_s1 + $0x10] sm:$0xff]  ;;  %vm595_vm4 = vcmask 7168  }
   0x2   :  { %v50_v1 = vld [vmem:[%s1034_s2] sm:$0xff]  ;;  %616 = vmatpush.msk.msra.mxu0 %vm117_vm0, %v67_v0  ;;  %v35_v5 = vld [vmem:[%s1036_s0 + $0x8] sm:$0xff]  ;;  %v36_v7 = vld [vmem:[%s1036_s0 + $0x10] sm:$0xff] }
   0x3   :  { %v51_v2 = vld [vmem:[%s1035_s1] sm:$0xff]  ;;  %250 = vmatpush.msra.mxu1 %v50_v1  ;;  %v54_v8 = vld [vmem:[%s1035_s1 + $0x18] sm:$0xff]  ;;  %v56_v12 = vld [vmem:[%s1035_s1 + $0x28] sm:$0xff] }
   0x4   :  { %v34_v3 = vld [vmem:[%s1036_s0] sm:$0xff]  ;;  %617 = vmatmul.msk.f32.vlgmr.msra.gmra.mxu0 %vm68_vm1, %v51_v2  ;;  %v37_v9 = vld [vmem:[%s1036_s0 + $0x18] sm:$0xff]  ;;  %v39_v13 = vld [vmem:[%s1036_s0 + $0x28] sm:$0xff] }
   0x5   :  { %633 = vmatmul.msk.f32.vlgmr.msra.gmra.mxu1 %vm186_vm2, %v34_v3  ;;  %v55_v10 = vld [vmem:[%s1035_s1 + $0x20] sm:$0xff]  ;;  %v57_v14 = vld [vmem:[%s1035_s1 + $0x30] sm:$0xff]  ;;  %v58_v16 = vld [vmem:[%s1035_s1 + $0x38] sm:$0xff] }
   0x6   :  { %v38_v11 = vld [vmem:[%s1036_s0 + $0x20] sm:$0xff]  ;;  %v40_v15 = vld [vmem:[%s1036_s0 + $0x30] sm:$0xff]  ;;  %v41_v17 = vld [vmem:[%s1036_s0 + $0x38] sm:$0xff] }
   0x7   :  { %v59_v18 = vld [vmem:[%s1035_s1 + $0x40] sm:$0xff]  ;;  %v60_v20 = vld [vmem:[%s1035_s1 + $0x48] sm:$0xff]  ;;  %v61_v22 = vld [vmem:[%s1035_s1 + $0x50] sm:$0xff] }
   0x8   :  { %v42_v19 = vld [vmem:[%s1036_s0 + $0x40] sm:$0xff]  ;;  %v43_v21 = vld [vmem:[%s1036_s0 + $0x48] sm:$0xff]  ;;  %v44_v23 = vld [vmem:[%s1036_s0 + $0x50] sm:$0xff] }
   0x9   :  { %v62_v24 = vld [vmem:[%s1035_s1 + $0x58] sm:$0xff]  ;;  %v63_v27 = vld [vmem:[%s1035_s1 + $0x60] sm:$0xff]  ;;  %v338_v29 = vld [vmem:[%s1038_s5 + $0x10] sm:$0xff] }
   0xa   :  { %v45_v25 = vld [vmem:[%s1036_s0 + $0x58] sm:$0xff]  ;;  %v46_v28 = vld [vmem:[%s1036_s0 + $0x60] sm:$0xff]  ;;  %v337_v30 = vld [vmem:[%s1038_s5 + $0x8] sm:$0xff] }
   0xb   :  { %v339_v26 = vld [vmem:[%s1038_s5 + $0x18] sm:$0xff]  ;;  %v336_v31 = vld [vmem:[%s1038_s5] sm:$0xff]  ;;  %v64_v32 = vld [vmem:[%s1035_s1 + $0x68] sm:$0xff] }
   0xc   :  { %618 = vmatmul.msk.f32.gmra.mxu0 %vm68_vm1, %v52_v4  ;;  %405 = vmatpush.msra.mxu2 %v339_v26  ;;  %v47_v33 = vld [vmem:[%s1036_s0 + $0x68] sm:$0xff]  ;;  %v65_v34 = vld [vmem:[%s1035_s1 + $0x70] sm:$0xff]  ;;  %v66_v36 = vld [vmem:[%s1035_s1 + $0x78] sm:$0xff] }
   0xd   :  { %634 = vmatmul.msk.f32.gmra.mxu1 %vm186_vm2, %v35_v5  ;;  %v48_v35 = vld [vmem:[%s1036_s0 + $0x70] sm:$0xff]  ;;  %v49_v37 = vld [vmem:[%s1036_s0 + $0x78] sm:$0xff]  ;;  %v883_v38 = vld [vmem:[%s1037_s4] ss:$0 sm:$0xff] }
   0xe   :  { %406 = vmatpush.msra.mxu2 %v338_v29 }
  0x10   :  { %407 = vmatpush.msra.mxu2 %v337_v30 }
  0x12   :  { %408 = vmatpush.msra.mxu2 %v336_v31 }
  0x14   :  { %619 = vmatmul.msk.f32.gmra.mxu0 %vm68_vm1, %v53_v6 }
  0x15   :  { %635 = vmatmul.msk.f32.gmra.mxu1 %vm186_vm2, %v36_v7 }
  0x1c   :  { %620 = vmatmul.msk.f32.gmra.mxu0 %vm68_vm1, %v54_v8 }
  0x1d   :  { %636 = vmatmul.msk.f32.gmra.mxu1 %vm186_vm2, %v37_v9 }
  0x24   :  { %621 = vmatmul.msk.f32.gmra.mxu0 %vm68_vm1, %v55_v10 }
  0x25   :  { %637 = vmatmul.msk.f32.gmra.mxu1 %vm186_vm2, %v38_v11 }
  0x2c   :  { %622 = vmatmul.msk.f32.gmra.mxu0 %vm68_vm1, %v56_v12 }
  0x2d   :  { %638 = vmatmul.msk.f32.gmra.mxu1 %vm186_vm2, %v39_v13 }
  0x34   :  { %623 = vmatmul.msk.f32.gmra.mxu0 %vm68_vm1, %v57_v14 }
  0x35   :  { %639 = vmatmul.msk.f32.gmra.mxu1 %vm186_vm2, %v40_v15 }
  0x3c   :  { %624 = vmatmul.msk.f32.gmra.mxu0 %vm68_vm1, %v58_v16 }
  0x3d   :  { %640 = vmatmul.msk.f32.gmra.mxu1 %vm186_vm2, %v41_v17 }
  0x44   :  { %625 = vmatmul.msk.f32.gmra.mxu0 %vm68_vm1, %v59_v18 }
  0x45   :  { %641 = vmatmul.msk.f32.gmra.mxu1 %vm186_vm2, %v42_v19 }
  0x4c   :  { %626 = vmatmul.msk.f32.gmra.mxu0 %vm68_vm1, %v60_v20 }
  0x4d   :  { %642 = vmatmul.msk.f32.gmra.mxu1 %vm186_vm2, %v43_v21 }
  0x54   :  { %627 = vmatmul.msk.f32.gmra.mxu0 %vm68_vm1, %v61_v22 }
  0x55   :  { %643 = vmatmul.msk.f32.gmra.mxu1 %vm186_vm2, %v44_v23 }
  0x5c   :  { %628 = vmatmul.msk.f32.gmra.mxu0 %vm68_vm1, %v62_v24 }
  0x5d   :  { %644 = vmatmul.msk.f32.gmra.mxu1 %vm186_vm2, %v45_v25 }
  0x64   :  { %629 = vmatmul.msk.f32.gmra.mxu0 %vm68_vm1, %v63_v27 }
  0x65   :  { %645 = vmatmul.msk.f32.gmra.mxu1 %vm186_vm2, %v46_v28 }
  0x6c   :  { %630 = vmatmul.msk.f32.gmra.mxu0 %vm68_vm1, %v64_v32 }
  0x6d   :  { %646 = vmatmul.msk.f32.gmra.mxu1 %vm186_vm2, %v47_v33 }
  0x74   :  { %631 = vmatmul.msk.f32.gmra.mxu0 %vm68_vm1, %v65_v34 }
  0x75   :  { %647 = vmatmul.msk.f32.gmra.mxu1 %vm186_vm2, %v48_v35  ;;  %v477_v35 = vld [vmem:[%s1040_s7 + $0x18] sm:$0xff] }
  0x76   :  { %542 = vmatpush.msra.mxu3 %v477_v35 }
  0x7c   :  { %632 = vmatmul.msk.f32.gmra.mxu0 %vm68_vm1, %v66_v36 }
  0x7d   :  { %648 = vmatmul.msk.f32.gmra.mxu1 %vm186_vm2, %v49_v37 }
  0x81   :  { %v138_v39 = vpop.f32.mrf.mxu0 }
  0x82   :  { %v252_v40 = vpop.f32.mrf.mxu1 }
  0x83   :  { %v253_v41 = vadd.f32 %v252_v40, %v138_v39 }
  0x85   :  { %v304_v42 = vadd.f32 %v883_v38, %v253_v41 }
  0x87   :  { %v320_v43 = vmax.f32 %v304_v42, 0.0 }
  0x89   :  { %649 = vmatmul.msk.f32.vlgmr.msra.gmra.mxu2 %vm344_vm3, %v320_v43  ;;  %v141_v44 = vpop.f32.mrf.mxu0 }
  0x8a   :  { %v255_v45 = vpop.f32.mrf.mxu1 }
  0x8b   :  { %v256_v46 = vadd.f32 %v255_v45, %v141_v44  ;;  %v476_v45 = vld [vmem:[%s1040_s7 + $0x10] sm:$0xff] }
  0x8c   :  { %543 = vmatpush.msra.mxu3 %v476_v45 }
  0x8d   :  { %v305_v47 = vadd.f32 %v883_v38, %v256_v46 }
  0x8f   :  { %v321_v48 = vmax.f32 %v305_v47, 0.0  ;;  %v475_v47 = vld [vmem:[%s1040_s7 + $0x8] sm:$0xff] }
  0x90   :  { %544 = vmatpush.msra.mxu3 %v475_v47 }
  0x91   :  { %650 = vmatmul.msk.f32.gmra.mxu2 %vm344_vm3, %v321_v48  ;;  %v144_v49 = vpop.f32.mrf.mxu0 }
  0x92   :  { %v258_v50 = vpop.f32.mrf.mxu1 }
  0x93   :  { %v259_v51 = vadd.f32 %v258_v50, %v144_v49  ;;  %v474_v49 = vld [vmem:[%s1040_s7] sm:$0xff] }
  0x94   :  { %545 = vmatpush.msra.mxu3 %v474_v49 }
  0x95   :  { %v306_v52 = vadd.f32 %v883_v38, %v259_v51 }
  0x97   :  { %v322_v53 = vmax.f32 %v306_v52, 0.0 }
  0x99   :  { %651 = vmatmul.msk.f32.gmra.mxu2 %vm344_vm3, %v322_v53  ;;  %v147_v54 = vpop.f32.mrf.mxu0 }
  0x9a   :  { %v261_v55 = vpop.f32.mrf.mxu1 }
  0x9b   :  { %v262_v56 = vadd.f32 %v261_v55, %v147_v54 }
  0x9d   :  { %v307_v57 = vadd.f32 %v883_v38, %v262_v56 }
  0x9f   :  { %v323_v58 = vmax.f32 %v307_v57, 0.0 }
  0xa1   :  { %652 = vmatmul.msk.f32.gmra.mxu2 %vm344_vm3, %v323_v58  ;;  %v150_v59 = vpop.f32.mrf.mxu0 }
  0xa2   :  { %v264_v60 = vpop.f32.mrf.mxu1 }
  0xa3   :  { %v265_v61 = vadd.f32 %v264_v60, %v150_v59  ;;  %v932_v60 = vld [vmem:[%s1039_s6] ss:$0 sm:$0xff] }
  0xa5   :  { %v308_v62 = vadd.f32 %v883_v38, %v265_v61 }
  0xa7   :  { %v324_v63 = vmax.f32 %v308_v62, 0.0 }
  0xa9   :  { %653 = vmatmul.msk.f32.gmra.mxu2 %vm344_vm3, %v324_v63  ;;  %v153_v0 = vpop.f32.mrf.mxu0 }
  0xaa   :  { %v267_v1 = vpop.f32.mrf.mxu1 }
  0xab   :  { %v268_v2 = vadd.f32 %v267_v1, %v153_v0 }
  0xad   :  { %v309_v3 = vadd.f32 %v883_v38, %v268_v2 }
  0xaf   :  { %v325_v4 = vmax.f32 %v309_v3, 0.0 }
  0xb1   :  { %654 = vmatmul.msk.f32.gmra.mxu2 %vm344_vm3, %v325_v4  ;;  %v156_v5 = vpop.f32.mrf.mxu0 }
  0xb2   :  { %v270_v6 = vpop.f32.mrf.mxu1 }
  0xb3   :  { %v271_v7 = vadd.f32 %v270_v6, %v156_v5 }
  0xb5   :  { %v310_v8 = vadd.f32 %v883_v38, %v271_v7 }
  0xb7   :  { %v326_v9 = vmax.f32 %v310_v8, 0.0 }
  0xb9   :  { %655 = vmatmul.msk.f32.gmra.mxu2 %vm344_vm3, %v326_v9  ;;  %v159_v10 = vpop.f32.mrf.mxu0 }
  0xba   :  { %v273_v11 = vpop.f32.mrf.mxu1 }
  0xbb   :  { %v274_v12 = vadd.f32 %v273_v11, %v159_v10 }
  0xbd   :  { %v311_v13 = vadd.f32 %v883_v38, %v274_v12 }
  0xbf   :  { %v327_v14 = vmax.f32 %v311_v13, 0.0 }
  0xc1   :  { %656 = vmatmul.msk.f32.gmra.mxu2 %vm344_vm3, %v327_v14  ;;  %v162_v15 = vpop.f32.mrf.mxu0 }
  0xc2   :  { %v276_v16 = vpop.f32.mrf.mxu1 }
  0xc3   :  { %v277_v17 = vadd.f32 %v276_v16, %v162_v15 }
  0xc5   :  { %v312_v18 = vadd.f32 %v883_v38, %v277_v17 }
  0xc7   :  { %v328_v19 = vmax.f32 %v312_v18, 0.0 }
  0xc9   :  { %657 = vmatmul.msk.f32.gmra.mxu2 %vm344_vm3, %v328_v19  ;;  %v165_v20 = vpop.f32.mrf.mxu0 }
  0xca   :  { %v279_v21 = vpop.f32.mrf.mxu1 }
  0xcb   :  { %v280_v22 = vadd.f32 %v279_v21, %v165_v20 }
  0xcd   :  { %v313_v23 = vadd.f32 %v883_v38, %v280_v22 }
  0xcf   :  { %v329_v24 = vmax.f32 %v313_v23, 0.0 }
  0xd1   :  { %658 = vmatmul.msk.f32.gmra.mxu2 %vm344_vm3, %v329_v24  ;;  %v168_v25 = vpop.f32.mrf.mxu0 }
  0xd2   :  { %v282_v26 = vpop.f32.mrf.mxu1 }
  0xd3   :  { %v283_v27 = vadd.f32 %v282_v26, %v168_v25 }
  0xd5   :  { %v314_v28 = vadd.f32 %v883_v38, %v283_v27 }
  0xd7   :  { %v330_v29 = vmax.f32 %v314_v28, 0.0 }
  0xd9   :  { %659 = vmatmul.msk.f32.gmra.mxu2 %vm344_vm3, %v330_v29  ;;  %v171_v30 = vpop.f32.mrf.mxu0 }
  0xda   :  { %v285_v31 = vpop.f32.mrf.mxu1 }
  0xdb   :  { %v286_v32 = vadd.f32 %v285_v31, %v171_v30 }
  0xdd   :  { %v315_v33 = vadd.f32 %v883_v38, %v286_v32  ;;  %v14_v32 = vstv %s1041_s8 }
  0xde   :  { %15 = vst [vmem:[#allocation2] sm:$0x1] %v14_v32 }
  0xdf   :  { %v331_v34 = vmax.f32 %v315_v33, 0.0 }
  0xe1   :  { %660 = vmatmul.msk.f32.gmra.mxu2 %vm344_vm3, %v331_v34  ;;  %v174_v36 = vpop.f32.mrf.mxu0 }
  0xe2   :  { %v288_v37 = vpop.f32.mrf.mxu1 }
  0xe3   :  { %v289_v39 = vadd.f32 %v288_v37, %v174_v36 }
  0xe5   :  { %v316_v40 = vadd.f32 %v883_v38, %v289_v39 }
  0xe7   :  { %v332_v41 = vmax.f32 %v316_v40, 0.0 }
  0xe9   :  { %661 = vmatmul.msk.f32.gmra.mxu2 %vm344_vm3, %v332_v41  ;;  %v177_v42 = vpop.f32.mrf.mxu0 }
  0xea   :  { %v291_v43 = vpop.f32.mrf.mxu1 }
  0xeb   :  { %v292_v44 = vadd.f32 %v291_v43, %v177_v42 }
  0xed   :  { %v317_v46 = vadd.f32 %v883_v38, %v292_v44 }
  0xef   :  { %v333_v48 = vmax.f32 %v317_v46, 0.0  ;;  %v683_v46 = vld [vmem:[#allocation2] ss:$0 sm:$0xff] }
  0xf1   :  { %662 = vmatmul.msk.f32.gmra.mxu2 %vm344_vm3, %v333_v48  ;;  %v180_v50 = vpop.f32.mrf.mxu0 }
  0xf2   :  { %v294_v51 = vpop.f32.mrf.mxu1 }
  0xf3   :  { %v295_v52 = vadd.f32 %v294_v51, %v180_v50 }
  0xf5   :  { %v318_v53 = vadd.f32 %v883_v38, %v295_v52 }
  0xf7   :  { %v334_v54 = vmax.f32 %v318_v53, 0.0 }
  0xf9   :  { %663 = vmatmul.msk.f32.gmra.mxu2 %vm344_vm3, %v334_v54  ;;  %v183_v55 = vpop.f32.mrf.mxu0 }
  0xfa   :  { %v297_v56 = vpop.f32.mrf.mxu1 }
  0xfb   :  { %v298_v57 = vadd.f32 %v297_v56, %v183_v55 }
  0xfd   :  { %v319_v58 = vadd.f32 %v883_v38, %v298_v57 }
  0xff   :  { %v335_v59 = vmax.f32 %v319_v58, 0.0 }
 0x101   :  { %664 = vmatmul.msk.f32.gmra.mxu2 %vm344_vm3, %v335_v59 }
 0x10c   :  { %v410_v61 = vpop.f32.mrf.mxu2 }
 0x10d   :  { %v411_v62 = vadd.f32 %v932_v60, %v410_v61 }
 0x10f   :  { %v458_v63 = vmax.f32 %v411_v62, 0.0 }
 0x111   :  { %665 = vmatmul.msk.f32.vlgmr.msra.gmra.mxu3 %vm344_vm3, %v458_v63 }
 0x114   :  { %v413_v0 = vpop.f32.mrf.mxu2 }
 0x115   :  { %v414_v1 = vadd.f32 %v932_v60, %v413_v0 }
 0x117   :  { %v459_v2 = vmax.f32 %v414_v1, 0.0 }
 0x119   :  { %666 = vmatmul.msk.f32.gmra.mxu3 %vm344_vm3, %v459_v2 }
 0x11c   :  { %v416_v38 = vpop.f32.mrf.mxu2 }
 0x11d   :  { %v417_v3 = vadd.f32 %v932_v60, %v416_v38 }
 0x11f   :  { %v460_v4 = vmax.f32 %v417_v3, 0.0 }
 0x121   :  { %667 = vmatmul.msk.f32.gmra.mxu3 %vm344_vm3, %v460_v4 }
 0x124   :  { %v419_v5 = vpop.f32.mrf.mxu2 }
 0x125   :  { %v420_v6 = vadd.f32 %v932_v60, %v419_v5 }
 0x127   :  { %v461_v7 = vmax.f32 %v420_v6, 0.0 }
 0x129   :  { %668 = vmatmul.msk.f32.gmra.mxu3 %vm344_vm3, %v461_v7 }
 0x12c   :  { %v422_v8 = vpop.f32.mrf.mxu2 }
 0x12d   :  { %v423_v9 = vadd.f32 %v932_v60, %v422_v8 }
 0x12f   :  { %v462_v10 = vmax.f32 %v423_v9, 0.0 }
 0x131   :  { %669 = vmatmul.msk.f32.gmra.mxu3 %vm344_vm3, %v462_v10 }
 0x134   :  { %v425_v11 = vpop.f32.mrf.mxu2 }
 0x135   :  { %v426_v12 = vadd.f32 %v932_v60, %v425_v11 }
 0x137   :  { %v463_v13 = vmax.f32 %v426_v12, 0.0 }
 0x139   :  { %670 = vmatmul.msk.f32.gmra.mxu3 %vm344_vm3, %v463_v13 }
 0x13c   :  { %v428_v14 = vpop.f32.mrf.mxu2 }
 0x13d   :  { %v429_v15 = vadd.f32 %v932_v60, %v428_v14 }
 0x13f   :  { %v464_v16 = vmax.f32 %v429_v15, 0.0 }
 0x141   :  { %671 = vmatmul.msk.f32.gmra.mxu3 %vm344_vm3, %v464_v16 }
 0x144   :  { %v431_v17 = vpop.f32.mrf.mxu2 }
 0x145   :  { %v432_v18 = vadd.f32 %v932_v60, %v431_v17 }
 0x147   :  { %v465_v19 = vmax.f32 %v432_v18, 0.0 }
 0x149   :  { %672 = vmatmul.msk.f32.gmra.mxu3 %vm344_vm3, %v465_v19 }
 0x14c   :  { %v434_v20 = vpop.f32.mrf.mxu2 }
 0x14d   :  { %v435_v21 = vadd.f32 %v932_v60, %v434_v20 }
 0x14f   :  { %v466_v22 = vmax.f32 %v435_v21, 0.0 }
 0x151   :  { %673 = vmatmul.msk.f32.gmra.mxu3 %vm344_vm3, %v466_v22 }
 0x154   :  { %v437_v23 = vpop.f32.mrf.mxu2 }
 0x155   :  { %v438_v24 = vadd.f32 %v932_v60, %v437_v23 }
 0x157   :  { %v467_v25 = vmax.f32 %v438_v24, 0.0 }
 0x159   :  { %674 = vmatmul.msk.f32.gmra.mxu3 %vm344_vm3, %v467_v25 }
 0x15c   :  { %v440_v26 = vpop.f32.mrf.mxu2 }
 0x15d   :  { %v441_v27 = vadd.f32 %v932_v60, %v440_v26 }
 0x15f   :  { %v468_v28 = vmax.f32 %v441_v27, 0.0 }
 0x161   :  { %675 = vmatmul.msk.f32.gmra.mxu3 %vm344_vm3, %v468_v28 }
 0x164   :  { %v443_v29 = vpop.f32.mrf.mxu2 }
 0x165   :  { %v444_v30 = vadd.f32 %v932_v60, %v443_v29 }
 0x167   :  { %v469_v31 = vmax.f32 %v444_v30, 0.0 }
 0x169   :  { %676 = vmatmul.msk.f32.gmra.mxu3 %vm344_vm3, %v469_v31 }
 0x16c   :  { %v446_v33 = vpop.f32.mrf.mxu2 }
 0x16d   :  { %v447_v34 = vadd.f32 %v932_v60, %v446_v33 }
 0x16f   :  { %v470_v35 = vmax.f32 %v447_v34, 0.0 }
 0x171   :  { %677 = vmatmul.msk.f32.gmra.mxu3 %vm344_vm3, %v470_v35 }
 0x174   :  { %v449_v36 = vpop.f32.mrf.mxu2 }
 0x175   :  { %v450_v37 = vadd.f32 %v932_v60, %v449_v36 }
 0x177   :  { %v471_v39 = vmax.f32 %v450_v37, 0.0 }
 0x179   :  { %678 = vmatmul.msk.f32.gmra.mxu3 %vm344_vm3, %v471_v39 }
 0x17c   :  { %v452_v40 = vpop.f32.mrf.mxu2 }
 0x17d   :  { %v453_v41 = vadd.f32 %v932_v60, %v452_v40 }
 0x17f   :  { %v472_v42 = vmax.f32 %v453_v41, 0.0 }
 0x181   :  { %679 = vmatmul.msk.f32.gmra.mxu3 %vm344_vm3, %v472_v42 }
 0x184   :  { %v455_v43 = vpop.f32.mrf.mxu2 }
 0x185   :  { %v456_v44 = vadd.f32 %v932_v60, %v455_v43 }
 0x187   :  { %v473_v45 = vmax.f32 %v456_v44, 0.0 }
 0x189   :  { %680 = vmatmul.msk.f32.gmra.mxu3 %vm344_vm3, %v473_v45 }
 0x194   :  { %v547_v47 = vpop.f32.mrf.mxu3 }
 0x195   :  { %v548_v48 = vadd.f32 %v683_v46, %v547_v47 }
 0x197   :  { %596 = vst.msk [vmem:[%s1042_s9] sm:$0xff] %vm595_vm4, %v548_v48 }
 0x19c   :  { %v550_v49 = vpop.f32.mrf.mxu3 }
 0x19d   :  { %v551_v50 = vadd.f32 %v683_v46, %v550_v49 }
 0x19f   :  { %597 = vst.msk [vmem:[%s1042_s9 + $0x8] sm:$0xff] %vm595_vm4, %v551_v50 }
 0x1a4   :  { %v553_v51 = vpop.f32.mrf.mxu3 }
 0x1a5   :  { %v554_v52 = vadd.f32 %v683_v46, %v553_v51 }
 0x1a7   :  { %598 = vst.msk [vmem:[%s1042_s9 + $0x10] sm:$0xff] %vm595_vm4, %v554_v52 }
 0x1ac   :  { %v556_v53 = vpop.f32.mrf.mxu3 }
 0x1ad   :  { %v557_v54 = vadd.f32 %v683_v46, %v556_v53 }
 0x1af   :  { %599 = vst.msk [vmem:[%s1042_s9 + $0x18] sm:$0xff] %vm595_vm4, %v557_v54 }
 0x1b4   :  { %v559_v55 = vpop.f32.mrf.mxu3 }
 0x1b5   :  { %v560_v56 = vadd.f32 %v683_v46, %v559_v55 }
 0x1b7   :  { %600 = vst.msk [vmem:[%s1042_s9 + $0x20] sm:$0xff] %vm595_vm4, %v560_v56 }
 0x1bc   :  { %v562_v57 = vpop.f32.mrf.mxu3 }
 0x1bd   :  { %v563_v58 = vadd.f32 %v683_v46, %v562_v57 }
 0x1bf   :  { %601 = vst.msk [vmem:[%s1042_s9 + $0x28] sm:$0xff] %vm595_vm4, %v563_v58 }
 0x1c4   :  { %v565_v59 = vpop.f32.mrf.mxu3 }
 0x1c5   :  { %v566_v60 = vadd.f32 %v683_v46, %v565_v59 }
 0x1c7   :  { %602 = vst.msk [vmem:[%s1042_s9 + $0x30] sm:$0xff] %vm595_vm4, %v566_v60 }
 0x1cc   :  { %v568_v61 = vpop.f32.mrf.mxu3 }
 0x1cd   :  { %v569_v62 = vadd.f32 %v683_v46, %v568_v61 }
 0x1cf   :  { %603 = vst.msk [vmem:[%s1042_s9 + $0x38] sm:$0xff] %vm595_vm4, %v569_v62 }
 0x1d4   :  { %v571_v63 = vpop.f32.mrf.mxu3 }
 0x1d5   :  { %v572_v0 = vadd.f32 %v683_v46, %v571_v63 }
 0x1d7   :  { %604 = vst.msk [vmem:[%s1042_s9 + $0x40] sm:$0xff] %vm595_vm4, %v572_v0 }
 0x1dc   :  { %v574_v1 = vpop.f32.mrf.mxu3 }
 0x1dd   :  { %v575_v2 = vadd.f32 %v683_v46, %v574_v1 }
 0x1df   :  { %605 = vst.msk [vmem:[%s1042_s9 + $0x48] sm:$0xff] %vm595_vm4, %v575_v2 }
 0x1e4   :  { %v577_v38 = vpop.f32.mrf.mxu3 }
 0x1e5   :  { %v578_v3 = vadd.f32 %v683_v46, %v577_v38 }
 0x1e7   :  { %606 = vst.msk [vmem:[%s1042_s9 + $0x50] sm:$0xff] %vm595_vm4, %v578_v3 }
 0x1ec   :  { %v580_v4 = vpop.f32.mrf.mxu3 }
 0x1ed   :  { %v581_v5 = vadd.f32 %v683_v46, %v580_v4 }
 0x1ef   :  { %607 = vst.msk [vmem:[%s1042_s9 + $0x58] sm:$0xff] %vm595_vm4, %v581_v5 }
 0x1f4   :  { %v583_v6 = vpop.f32.mrf.mxu3 }
 0x1f5   :  { %v584_v7 = vadd.f32 %v683_v46, %v583_v6 }
 0x1f7   :  { %608 = vst.msk [vmem:[%s1042_s9 + $0x60] sm:$0xff] %vm595_vm4, %v584_v7 }
 0x1fc   :  { %v586_v8 = vpop.f32.mrf.mxu3 }
 0x1fd   :  { %v587_v9 = vadd.f32 %v683_v46, %v586_v8 }
 0x1ff   :  { %609 = vst.msk [vmem:[%s1042_s9 + $0x68] sm:$0xff] %vm595_vm4, %v587_v9 }
 0x204   :  { %v589_v10 = vpop.f32.mrf.mxu3 }
 0x205   :  { %v590_v11 = vadd.f32 %v683_v46, %v589_v10 }
 0x207   :  { %610 = vst.msk [vmem:[%s1042_s9 + $0x70] sm:$0xff] %vm595_vm4, %v590_v11 }
 0x20c   :  { %v592_v12 = vpop.f32.mrf.mxu3 }
 0x20d   :  { %v593_v13 = vadd.f32 %v683_v46, %v592_v12 }
 0x20f   :  { %611 = vst.msk [vmem:[%s1042_s9 + $0x78] sm:$0xff] %vm595_vm4, %v593_v13 }

</bundles_post_ra>
